<compile_context>
chip_gen: v5e
topology: v5e:2x2
jax: 0.10.0
libtpu: 0.0.40
codegen_flags: <defaults>
</compile_context>

<pallas_src>
import functools
import math

import jax
import jax.numpy as jnp
import numpy as np
from jax import lax
from jax.experimental import pallas as pl
from jax.experimental.pallas import tpu as pltpu

_EPS = 1e-5


def _round_up(v, m):
    return ((v + m - 1) // m) * m


def _block_kernel(xs_ref, m1_ref, m2_ref, w1_ref, w2_ref,
                  g1_ref, b1_ref, g2_ref, b2_ref, out_ref, *, n_batch, seq_len):
    # xs_ref : (C, N*Lp)  lane-dense input; segment n = lanes [n*Lp, n*Lp+L), zeros elsewhere
    # m1_ref : (1, N*Lp)  1.0 where pos-in-segment < L-2 (conv1 output validity)
    # m2_ref : (1, N*Lp)  1.0 where pos-in-segment < L-4 (conv2 output validity)
    # w*_ref : (5, C, C)  per-tap weights, w_t[k, o, ci] = torch_w[o, ci, k]
    # g*/b*  : (C, 1)     BN affine parameters
    # out_ref: (C, N*Lp)  valid output = first L-4 lanes of each segment
    C, W = xs_ref.shape
    L = seq_len
    L1, L2 = L - 2, L - 4

    xs = xs_ref[...]
    m1 = m1_ref[...]
    m2 = m2_ref[...]

    def conv5(w_ref, src):
        # out[o, j] = sum_{k, ci} w[k, o, ci] * src[ci, j + k - 1]; out-of-range taps read the
        # zeroed segment pads (Lp >= L+1), so padding=1 conv semantics fall out automatically.
        # Lanes contaminated by the circular wrap land past pos L-2 and are masked downstream.
        acc = jnp.dot(w_ref[1], src, preferred_element_type=jnp.float32)
        for k in (0, 2, 3, 4):
            s_k = pltpu.roll(src, shift=(1 - k) % W, axis=1)
            acc = acc + jnp.dot(w_ref[k], s_k, preferred_element_type=jnp.float32)
        return acc

    def batchnorm(acc, mask, count, g_ref, b_ref):
        accm = acc * mask                      # exclude pad lanes from the batch statistics
        inv = 1.0 / float(count)
        mean = jnp.sum(accm, axis=1, keepdims=True) * inv
        var = jnp.sum(accm * accm, axis=1, keepdims=True) * inv - mean * mean
        var = jnp.maximum(var, 0.0)            # guard one-pass cancellation
        return (acc - mean) * lax.rsqrt(var + _EPS) * g_ref[...] + b_ref[...]

    # conv1 -> bn1 -> relu (mask pad lanes so they don't leak into conv2 taps / bn2 stats)
    acc1 = conv5(w1_ref, xs)
    h = jnp.maximum(batchnorm(acc1, m1, n_batch * L1, g1_ref, b1_ref), 0.0) * m1

    # conv2 -> bn2
    acc2 = conv5(w2_ref, h)
    o2 = batchnorm(acc2, m2, n_batch * L2, g2_ref, b2_ref)

    # residual trim + add + relu; stored lane-dense (full-width unmasked vst).  Pad lanes hold
    # don't-care values and are sliced off by the wrapper.
    out_ref[...] = jnp.maximum(xs + o2, 0.0)


def basic_block_5x5_fft(x, w1, w2, g1, b1, g2, b2):
    """x: (N, C, L) f32; w1, w2: (C, C, 5) f32 (PyTorch Conv1d weight layout)."""
    N, C, L = x.shape
    L2 = L - 4
    assert L2 >= 1 and w1.shape == (C, C, 5) and w2.shape == (C, C, 5)

    # 128-aligned per-batch lane segments with at least one zero-pad lane on the right.
    Lp = _round_up(L + 1, 128)
    W = N * Lp

    # Single-invocation design: whole problem resident in VMEM (in/out slabs + ~a dozen live
    # (C, W) f32 temporaries).  Budgeted against v7x's 32 MiB scoped / 64 MiB physical VMEM.
    assert 16 * 4 * C * W <= 24 * 1024 * 1024, "too large for the single-block kernel; add a grid"

    f32 = jnp.float32
    # xs[c, n*Lp + l] = x[n, c, l]; zeros in the pad lanes [L, Lp) of every segment.
    xpad = jnp.pad(x.astype(f32), ((0, 0), (0, 0), (0, Lp - L)))
    xs = jnp.transpose(xpad, (1, 0, 2)).reshape(C, W)

    # 0/1 validity masks, periodic per segment (built once, outside the kernel).
    pos = jnp.arange(Lp)
    m1 = jnp.tile((pos < L - 2).astype(f32), N).reshape(1, W)
    m2 = jnp.tile((pos < L2).astype(f32), N).reshape(1, W)

    # per-tap weights: w_t[k, o, ci] = w[o, ci, k]
    w1t = jnp.transpose(w1.astype(f32), (2, 0, 1))
    w2t = jnp.transpose(w2.astype(f32), (2, 0, 1))
    g1c = g1.reshape(C, 1).astype(f32)
    b1c = b1.reshape(C, 1).astype(f32)
    g2c = g2.reshape(C, 1).astype(f32)
    b2c = b2.reshape(C, 1).astype(f32)

    vmem = pl.BlockSpec(memory_space=pltpu.MemorySpace.VMEM)
    kernel = functools.partial(_block_kernel, n_batch=N, seq_len=L)
    o_slab = pl.pallas_call(
        kernel,
        out_shape=jax.ShapeDtypeStruct((C, W), f32),
        in_specs=[vmem] * 9,
        out_specs=vmem,
        compiler_params=pltpu.CompilerParams(vmem_limit_bytes=32 * 1024 * 1024),
    )(xs, m1, m2, w1t, w2t, g1c, b1c, g2c, b2c)

    # lane-dense slab -> PyTorch (N, C, L-4) layout (wrapper-side layout plumbing only).
    return jnp.transpose(o_slab.reshape(C, N, Lp)[:, :, :L2], (1, 0, 2))


def _reference(x, w1, w2, g1, b1, g2, b2):
    """Pure-JAX reference (PyTorch semantics, training-mode BN)."""
    dn = ("NCH", "OIH", "NCH")
    prec = lax.Precision.HIGHEST

    def bn(o, g, b):
        m = jnp.mean(o, axis=(0, 2), keepdims=True)
        v = jnp.mean((o - m) ** 2, axis=(0, 2), keepdims=True)
        return (o - m) * lax.rsqrt(v + _EPS) * g.reshape(1, -1, 1) + b.reshape(1, -1, 1)

    o = lax.conv_general_dilated(x, w1, (1,), [(1, 1)], dimension_numbers=dn, precision=prec)
    o = jnp.maximum(bn(o, g1, b1), 0.0)
    o = lax.conv_general_dilated(o, w2, (1,), [(1, 1)], dimension_numbers=dn, precision=prec)
    o = bn(o, g2, b2)
    d = x.shape[2] - o.shape[2]
    return jnp.maximum(x[:, :, 0:-d] + o, 0.0)


if __name__ == "__main__":
    N, C, L = 2, 8, 32     # batch, channels (inplanes == planes), sequence length

    key = jax.random.PRNGKey(0)
    ks = jax.random.split(key, 7)
    x = jax.random.normal(ks[0], (N, C, L), jnp.float32)

    # deterministic parameter init (shapes from the module's __init__)
    bound = 1.0 / math.sqrt(C * 5)                         # kaiming-uniform-like
    w1 = jax.random.uniform(ks[1], (C, C, 5), jnp.float32, -bound, bound)
    w2 = jax.random.uniform(ks[2], (C, C, 5), jnp.float32, -bound, bound)
    g1 = 1.0 + 0.1 * jax.random.normal(ks[3], (C,), jnp.float32)
    b1 = 0.1 * jax.random.normal(ks[4], (C,), jnp.float32)
    g2 = 1.0 + 0.1 * jax.random.normal(ks[5], (C,), jnp.float32)
    b2 = 0.1 * jax.random.normal(ks[6], (C,), jnp.float32)

    out = jax.block_until_ready(basic_block_5x5_fft(x, w1, w2, g1, b1, g2, b2))
    assert out.shape == (N, C, L - 4), out.shape

    ref = _reference(x, w1, w2, g1, b1, g2, b2)
    np.testing.assert_allclose(np.asarray(out), np.asarray(ref), rtol=1e-3, atol=1e-3)

    print("KERNEL_OK")
</pallas_src>

<mosaic_0001>
module attributes {stable_mosaic.version = 11 : i64} {
  func.func @_block_kernel(%arg0: memref<8x256xf32, #tpu.memory_space<vmem>>, %arg1: memref<1x256xf32, #tpu.memory_space<vmem>>, %arg2: memref<1x256xf32, #tpu.memory_space<vmem>>, %arg3: memref<5x8x8xf32, #tpu.memory_space<vmem>>, %arg4: memref<5x8x8xf32, #tpu.memory_space<vmem>>, %arg5: memref<8x1xf32, #tpu.memory_space<vmem>>, %arg6: memref<8x1xf32, #tpu.memory_space<vmem>>, %arg7: memref<8x1xf32, #tpu.memory_space<vmem>>, %arg8: memref<8x1xf32, #tpu.memory_space<vmem>>, %arg9: memref<8x256xf32, #tpu.memory_space<vmem>>) attributes {dimension_semantics = [], scalar_prefetch = 0 : i64, scratch_operands = 0 : i64, tpu.core_type = #tpu.core_type<tc>} {
    %c0 = arith.constant 0 : index
    %c0_0 = arith.constant 0 : index
    %0 = vector.load %arg0[%c0, %c0_0] : memref<8x256xf32, #tpu.memory_space<vmem>>, vector<8x256xf32>
    %c0_1 = arith.constant 0 : index
    %c0_2 = arith.constant 0 : index
    %1 = vector.load %arg1[%c0_1, %c0_2] : memref<1x256xf32, #tpu.memory_space<vmem>>, vector<1x256xf32>
    %c0_3 = arith.constant 0 : index
    %c0_4 = arith.constant 0 : index
    %2 = vector.load %arg2[%c0_3, %c0_4] : memref<1x256xf32, #tpu.memory_space<vmem>>, vector<1x256xf32>
    %c1 = arith.constant 1 : index
    %c0_5 = arith.constant 0 : index
    %c0_6 = arith.constant 0 : index
    %3 = vector.load %arg3[%c1, %c0_5, %c0_6] : memref<5x8x8xf32, #tpu.memory_space<vmem>>, vector<1x8x8xf32>
    %4 = vector.shape_cast %3 : vector<1x8x8xf32> to vector<8x8xf32>
    %cst = arith.constant dense<0.000000e+00> : vector<8x256xf32>
    %5 = tpu.matmul %4, %0, %cst {dimension_numbers = #tpu.dot_dimension_numbers<[1], [0], [0], [1], [0, 0, 1, 1], [], []>} : vector<8x8xf32>, vector<8x256xf32>, vector<8x256xf32> -> vector<8x256xf32>
    %c1_i32 = arith.constant 1 : i32
    %6 = tpu.dynamic_rotate %0 by %c1_i32 dim 1 : vector<8x256xf32>, i32 -> vector<8x256xf32>
    %c0_7 = arith.constant 0 : index
    %c0_8 = arith.constant 0 : index
    %c0_9 = arith.constant 0 : index
    %7 = vector.load %arg3[%c0_7, %c0_8, %c0_9] : memref<5x8x8xf32, #tpu.memory_space<vmem>>, vector<1x8x8xf32>
    %8 = vector.shape_cast %7 : vector<1x8x8xf32> to vector<8x8xf32>
    %cst_10 = arith.constant dense<0.000000e+00> : vector<8x256xf32>
    %9 = tpu.matmul %8, %6, %cst_10 {dimension_numbers = #tpu.dot_dimension_numbers<[1], [0], [0], [1], [0, 0, 1, 1], [], []>} : vector<8x8xf32>, vector<8x256xf32>, vector<8x256xf32> -> vector<8x256xf32>
    %10 = arith.addf %5, %9 : vector<8x256xf32>
    %c255_i32 = arith.constant 255 : i32
    %11 = tpu.dynamic_rotate %0 by %c255_i32 dim 1 : vector<8x256xf32>, i32 -> vector<8x256xf32>
    %c2 = arith.constant 2 : index
    %c0_11 = arith.constant 0 : index
    %c0_12 = arith.constant 0 : index
    %12 = vector.load %arg3[%c2, %c0_11, %c0_12] : memref<5x8x8xf32, #tpu.memory_space<vmem>>, vector<1x8x8xf32>
    %13 = vector.shape_cast %12 : vector<1x8x8xf32> to vector<8x8xf32>
    %cst_13 = arith.constant dense<0.000000e+00> : vector<8x256xf32>
    %14 = tpu.matmul %13, %11, %cst_13 {dimension_numbers = #tpu.dot_dimension_numbers<[1], [0], [0], [1], [0, 0, 1, 1], [], []>} : vector<8x8xf32>, vector<8x256xf32>, vector<8x256xf32> -> vector<8x256xf32>
    %15 = arith.addf %10, %14 : vector<8x256xf32>
    %c254_i32 = arith.constant 254 : i32
    %16 = tpu.dynamic_rotate %0 by %c254_i32 dim 1 : vector<8x256xf32>, i32 -> vector<8x256xf32>
    %c3 = arith.constant 3 : index
    %c0_14 = arith.constant 0 : index
    %c0_15 = arith.constant 0 : index
    %17 = vector.load %arg3[%c3, %c0_14, %c0_15] : memref<5x8x8xf32, #tpu.memory_space<vmem>>, vector<1x8x8xf32>
    %18 = vector.shape_cast %17 : vector<1x8x8xf32> to vector<8x8xf32>
    %cst_16 = arith.constant dense<0.000000e+00> : vector<8x256xf32>
    %19 = tpu.matmul %18, %16, %cst_16 {dimension_numbers = #tpu.dot_dimension_numbers<[1], [0], [0], [1], [0, 0, 1, 1], [], []>} : vector<8x8xf32>, vector<8x256xf32>, vector<8x256xf32> -> vector<8x256xf32>
    %20 = arith.addf %15, %19 : vector<8x256xf32>
    %c253_i32 = arith.constant 253 : i32
    %21 = tpu.dynamic_rotate %0 by %c253_i32 dim 1 : vector<8x256xf32>, i32 -> vector<8x256xf32>
    %c4 = arith.constant 4 : index
    %c0_17 = arith.constant 0 : index
    %c0_18 = arith.constant 0 : index
    %22 = vector.load %arg3[%c4, %c0_17, %c0_18] : memref<5x8x8xf32, #tpu.memory_space<vmem>>, vector<1x8x8xf32>
    %23 = vector.shape_cast %22 : vector<1x8x8xf32> to vector<8x8xf32>
    %cst_19 = arith.constant dense<0.000000e+00> : vector<8x256xf32>
    %24 = tpu.matmul %23, %21, %cst_19 {dimension_numbers = #tpu.dot_dimension_numbers<[1], [0], [0], [1], [0, 0, 1, 1], [], []>} : vector<8x8xf32>, vector<8x256xf32>, vector<8x256xf32> -> vector<8x256xf32>
    %25 = arith.addf %20, %24 : vector<8x256xf32>
    %26 = vector.broadcast %1 : vector<1x256xf32> to vector<8x256xf32>
    %27 = arith.mulf %25, %26 : vector<8x256xf32>
    %cst_20 = arith.constant dense<0.000000e+00> : vector<8xf32>
    %28 = vector.multi_reduction <add>, %27, %cst_20 [1] : vector<8x256xf32> to vector<8xf32>
    %29 = vector.shape_cast %28 : vector<8xf32> to vector<8x1xf32>
    %cst_21 = arith.constant 0.0166666675 : f32
    %30 = vector.broadcast %cst_21 : f32 to vector<8x1xf32>
    %31 = arith.mulf %29, %30 : vector<8x1xf32>
    %32 = arith.mulf %27, %27 : vector<8x256xf32>
    %cst_22 = arith.constant dense<0.000000e+00> : vector<8xf32>
    %33 = vector.multi_reduction <add>, %32, %cst_22 [1] : vector<8x256xf32> to vector<8xf32>
    %34 = vector.shape_cast %33 : vector<8xf32> to vector<8x1xf32>
    %cst_23 = arith.constant 0.0166666675 : f32
    %35 = vector.broadcast %cst_23 : f32 to vector<8x1xf32>
    %36 = arith.mulf %34, %35 : vector<8x1xf32>
    %37 = arith.mulf %31, %31 : vector<8x1xf32>
    %38 = arith.subf %36, %37 : vector<8x1xf32>
    %cst_24 = arith.constant 0.000000e+00 : f32
    %39 = vector.broadcast %cst_24 : f32 to vector<8x1xf32>
    %40 = arith.maximumf %38, %39 : vector<8x1xf32>
    %41 = vector.broadcast %31 : vector<8x1xf32> to vector<8x256xf32>
    %42 = arith.subf %25, %41 : vector<8x256xf32>
    %cst_25 = arith.constant 9.99999974E-6 : f32
    %43 = vector.broadcast %cst_25 : f32 to vector<8x1xf32>
    %44 = arith.addf %40, %43 : vector<8x1xf32>
    %45 = math.rsqrt %44 : vector<8x1xf32>
    %46 = vector.broadcast %45 : vector<8x1xf32> to vector<8x256xf32>
    %47 = arith.mulf %42, %46 : vector<8x256xf32>
    %c0_26 = arith.constant 0 : index
    %c0_27 = arith.constant 0 : index
    %48 = vector.load %arg5[%c0_26, %c0_27] : memref<8x1xf32, #tpu.memory_space<vmem>>, vector<8x1xf32>
    %49 = vector.broadcast %48 : vector<8x1xf32> to vector<8x256xf32>
    %50 = arith.mulf %47, %49 : vector<8x256xf32>
    %c0_28 = arith.constant 0 : index
    %c0_29 = arith.constant 0 : index
    %51 = vector.load %arg6[%c0_28, %c0_29] : memref<8x1xf32, #tpu.memory_space<vmem>>, vector<8x1xf32>
    %52 = vector.broadcast %51 : vector<8x1xf32> to vector<8x256xf32>
    %53 = arith.addf %50, %52 : vector<8x256xf32>
    %cst_30 = arith.constant 0.000000e+00 : f32
    %54 = vector.broadcast %cst_30 : f32 to vector<8x256xf32>
    %55 = arith.maximumf %53, %54 : vector<8x256xf32>
    %56 = vector.broadcast %1 : vector<1x256xf32> to vector<8x256xf32>
    %57 = arith.mulf %55, %56 : vector<8x256xf32>
    %c1_31 = arith.constant 1 : index
    %c0_32 = arith.constant 0 : index
    %c0_33 = arith.constant 0 : index
    %58 = vector.load %arg4[%c1_31, %c0_32, %c0_33] : memref<5x8x8xf32, #tpu.memory_space<vmem>>, vector<1x8x8xf32>
    %59 = vector.shape_cast %58 : vector<1x8x8xf32> to vector<8x8xf32>
    %cst_34 = arith.constant dense<0.000000e+00> : vector<8x256xf32>
    %60 = tpu.matmul %59, %57, %cst_34 {dimension_numbers = #tpu.dot_dimension_numbers<[1], [0], [0], [1], [0, 0, 1, 1], [], []>} : vector<8x8xf32>, vector<8x256xf32>, vector<8x256xf32> -> vector<8x256xf32>
    %c1_i32_35 = arith.constant 1 : i32
    %61 = tpu.dynamic_rotate %57 by %c1_i32_35 dim 1 : vector<8x256xf32>, i32 -> vector<8x256xf32>
    %c0_36 = arith.constant 0 : index
    %c0_37 = arith.constant 0 : index
    %c0_38 = arith.constant 0 : index
    %62 = vector.load %arg4[%c0_36, %c0_37, %c0_38] : memref<5x8x8xf32, #tpu.memory_space<vmem>>, vector<1x8x8xf32>
    %63 = vector.shape_cast %62 : vector<1x8x8xf32> to vector<8x8xf32>
    %cst_39 = arith.constant dense<0.000000e+00> : vector<8x256xf32>
    %64 = tpu.matmul %63, %61, %cst_39 {dimension_numbers = #tpu.dot_dimension_numbers<[1], [0], [0], [1], [0, 0, 1, 1], [], []>} : vector<8x8xf32>, vector<8x256xf32>, vector<8x256xf32> -> vector<8x256xf32>
    %65 = arith.addf %60, %64 : vector<8x256xf32>
    %c255_i32_40 = arith.constant 255 : i32
    %66 = tpu.dynamic_rotate %57 by %c255_i32_40 dim 1 : vector<8x256xf32>, i32 -> vector<8x256xf32>
    %c2_41 = arith.constant 2 : index
    %c0_42 = arith.constant 0 : index
    %c0_43 = arith.constant 0 : index
    %67 = vector.load %arg4[%c2_41, %c0_42, %c0_43] : memref<5x8x8xf32, #tpu.memory_space<vmem>>, vector<1x8x8xf32>
    %68 = vector.shape_cast %67 : vector<1x8x8xf32> to vector<8x8xf32>
    %cst_44 = arith.constant dense<0.000000e+00> : vector<8x256xf32>
    %69 = tpu.matmul %68, %66, %cst_44 {dimension_numbers = #tpu.dot_dimension_numbers<[1], [0], [0], [1], [0, 0, 1, 1], [], []>} : vector<8x8xf32>, vector<8x256xf32>, vector<8x256xf32> -> vector<8x256xf32>
    %70 = arith.addf %65, %69 : vector<8x256xf32>
    %c254_i32_45 = arith.constant 254 : i32
    %71 = tpu.dynamic_rotate %57 by %c254_i32_45 dim 1 : vector<8x256xf32>, i32 -> vector<8x256xf32>
    %c3_46 = arith.constant 3 : index
    %c0_47 = arith.constant 0 : index
    %c0_48 = arith.constant 0 : index
    %72 = vector.load %arg4[%c3_46, %c0_47, %c0_48] : memref<5x8x8xf32, #tpu.memory_space<vmem>>, vector<1x8x8xf32>
    %73 = vector.shape_cast %72 : vector<1x8x8xf32> to vector<8x8xf32>
    %cst_49 = arith.constant dense<0.000000e+00> : vector<8x256xf32>
    %74 = tpu.matmul %73, %71, %cst_49 {dimension_numbers = #tpu.dot_dimension_numbers<[1], [0], [0], [1], [0, 0, 1, 1], [], []>} : vector<8x8xf32>, vector<8x256xf32>, vector<8x256xf32> -> vector<8x256xf32>
    %75 = arith.addf %70, %74 : vector<8x256xf32>
    %c253_i32_50 = arith.constant 253 : i32
    %76 = tpu.dynamic_rotate %57 by %c253_i32_50 dim 1 : vector<8x256xf32>, i32 -> vector<8x256xf32>
    %c4_51 = arith.constant 4 : index
    %c0_52 = arith.constant 0 : index
    %c0_53 = arith.constant 0 : index
    %77 = vector.load %arg4[%c4_51, %c0_52, %c0_53] : memref<5x8x8xf32, #tpu.memory_space<vmem>>, vector<1x8x8xf32>
    %78 = vector.shape_cast %77 : vector<1x8x8xf32> to vector<8x8xf32>
    %cst_54 = arith.constant dense<0.000000e+00> : vector<8x256xf32>
    %79 = tpu.matmul %78, %76, %cst_54 {dimension_numbers = #tpu.dot_dimension_numbers<[1], [0], [0], [1], [0, 0, 1, 1], [], []>} : vector<8x8xf32>, vector<8x256xf32>, vector<8x256xf32> -> vector<8x256xf32>
    %80 = arith.addf %75, %79 : vector<8x256xf32>
    %81 = vector.broadcast %2 : vector<1x256xf32> to vector<8x256xf32>
    %82 = arith.mulf %80, %81 : vector<8x256xf32>
    %cst_55 = arith.constant dense<0.000000e+00> : vector<8xf32>
    %83 = vector.multi_reduction <add>, %82, %cst_55 [1] : vector<8x256xf32> to vector<8xf32>
    %84 = vector.shape_cast %83 : vector<8xf32> to vector<8x1xf32>
    %cst_56 = arith.constant 0.0178571437 : f32
    %85 = vector.broadcast %cst_56 : f32 to vector<8x1xf32>
    %86 = arith.mulf %84, %85 : vector<8x1xf32>
    %87 = arith.mulf %82, %82 : vector<8x256xf32>
    %cst_57 = arith.constant dense<0.000000e+00> : vector<8xf32>
    %88 = vector.multi_reduction <add>, %87, %cst_57 [1] : vector<8x256xf32> to vector<8xf32>
    %89 = vector.shape_cast %88 : vector<8xf32> to vector<8x1xf32>
    %cst_58 = arith.constant 0.0178571437 : f32
    %90 = vector.broadcast %cst_58 : f32 to vector<8x1xf32>
    %91 = arith.mulf %89, %90 : vector<8x1xf32>
    %92 = arith.mulf %86, %86 : vector<8x1xf32>
    %93 = arith.subf %91, %92 : vector<8x1xf32>
    %cst_59 = arith.constant 0.000000e+00 : f32
    %94 = vector.broadcast %cst_59 : f32 to vector<8x1xf32>
    %95 = arith.maximumf %93, %94 : vector<8x1xf32>
    %96 = vector.broadcast %86 : vector<8x1xf32> to vector<8x256xf32>
    %97 = arith.subf %80, %96 : vector<8x256xf32>
    %cst_60 = arith.constant 9.99999974E-6 : f32
    %98 = vector.broadcast %cst_60 : f32 to vector<8x1xf32>
    %99 = arith.addf %95, %98 : vector<8x1xf32>
    %100 = math.rsqrt %99 : vector<8x1xf32>
    %101 = vector.broadcast %100 : vector<8x1xf32> to vector<8x256xf32>
    %102 = arith.mulf %97, %101 : vector<8x256xf32>
    %c0_61 = arith.constant 0 : index
    %c0_62 = arith.constant 0 : index
    %103 = vector.load %arg7[%c0_61, %c0_62] : memref<8x1xf32, #tpu.memory_space<vmem>>, vector<8x1xf32>
    %104 = vector.broadcast %103 : vector<8x1xf32> to vector<8x256xf32>
    %105 = arith.mulf %102, %104 : vector<8x256xf32>
    %c0_63 = arith.constant 0 : index
    %c0_64 = arith.constant 0 : index
    %106 = vector.load %arg8[%c0_63, %c0_64] : memref<8x1xf32, #tpu.memory_space<vmem>>, vector<8x1xf32>
    %107 = vector.broadcast %106 : vector<8x1xf32> to vector<8x256xf32>
    %108 = arith.addf %105, %107 : vector<8x256xf32>
    %109 = arith.addf %0, %108 : vector<8x256xf32>
    %cst_65 = arith.constant 0.000000e+00 : f32
    %110 = vector.broadcast %cst_65 : f32 to vector<8x256xf32>
    %111 = arith.maximumf %109, %110 : vector<8x256xf32>
    %c0_66 = arith.constant 0 : index
    %c0_67 = arith.constant 0 : index
    %112 = vector.load %arg9[%c0_66, %c0_67] : memref<8x256xf32, #tpu.memory_space<vmem>>, vector<8x256xf32>
    tpu.vector_store %arg9[%c0_66, %c0_67], %111 {strides = array<i32>} : memref<8x256xf32, #tpu.memory_space<vmem>>, vector<8x256xf32>,
    return
  }
}

</mosaic_0001>

<bundles_post_ra>
// kernel: tpu_custom_call.1
= control target key start
LH: loop header
LB: loop body
LE: loop exit
PB: predicated region body
PF: predicated region fallthrough
CT: control target
= control target key end

     0   :  { %14 = vsyncpa [#allocation3], 0  ;;  %s1038_s0 = inlined_call_operand.vmem [shape: f32[8,256], index: 0, kind: input, shape index: {}]   ;;  %s1039_s1 = inlined_call_operand.vmem [shape: f32[1,256], index: 1, kind: input, shape index: {}]   ;;  %s1040_s2 = inlined_call_operand.vmem [shape: f32[1,256], index: 2, kind: input, shape index: {}]   ;;  %s1041_s3 = inlined_call_operand.hbm [shape: f32[5,8,8], index: 3, kind: input, shape index: {}]   ;;  %s1042_s4 = inlined_call_operand.hbm [shape: f32[5,8,8], index: 4, kind: input, shape index: {}]   ;;  %s1043_s5 = inlined_call_operand.vmem [shape: f32[8,1], index: 5, kind: input, shape index: {}]   ;;  %s1044_s6 = inlined_call_operand.vmem [shape: f32[8,1], index: 6, kind: input, shape index: {}]   ;;  %s1045_s7 = inlined_call_operand.vmem [shape: f32[8,1], index: 7, kind: input, shape index: {}]   ;;  %s1046_s8 = inlined_call_operand.vmem [shape: f32[8,1], index: 8, kind: input, shape index: {}]   ;;  %s1047_s9 = inlined_call_operand.hbm [shape: f32[8,256], index: 9, kind: output, shape index: {}]  }
   0x1   :  { %15 = vsyncpa [#allocation6], 0 }
   0x2   :  { %16 = vsyncpa [#allocation4], 0  ;;  %s27_s11 = sshll.u32 %s1041_s3, 4  ;;  %s869_s12 = smov [#allocation2]   ;;  %s28_s11 = int_to_ptr.hbm [resolvable:$true] %s27_s11 }
   0x3   :  { %s29_s13 = sshll.u32 %s869_s12, 4  ;;  %s40_s16 = sshll.u32 %s1042_s4, 4  ;;  %s30_s13 = int_to_ptr.vmem [resolvable:$true] %s29_s13  ;;  %s41_s16 = int_to_ptr.hbm [resolvable:$true] %s40_s16 }
   0x4   :  { %s870_s17 = smov 128   ;;  %s871_s18 = smov 8  }
   0x5   :  { %35 = dma.hbm_to_vmem [thread:$0]  %s28_s11, 640, %s30_s13, [#allocation3], %s870_s17, %s870_s17, %s871_s18  }
   0x6   :  { %s872_s19 = smov [#allocation5]  }
   0x7   :  { %s42_s20 = sshll.u32 %s872_s19, 4  ;;  %s43_s20 = int_to_ptr.vmem [resolvable:$true] %s42_s20 }
   0x8   :  { %48 = dma.hbm_to_vmem [thread:$0]  %s41_s16, 640, %s43_s20, [#allocation6], %s870_s17, %s870_s17, %s871_s18  }
   0x9   :  { %863 = dma.done.wait [#allocation3], 640  }
   0xa   :  { %864 = vsyncadd [#allocation3], 4294966656 }
   0xb   :  { %865 = dma.done.wait [#allocation6], 640  }
   0xc   :  { %866 = vsyncadd [#allocation6], 4294966656  ;;  %vm81_vm0 = vcmask 64512   ;;  %v938_v0 = vld [vmem:[%s1038_s0] sm:$0xff]  ;;  %v943_v1 = vld [vmem:[%s1038_s0 + $0x8] sm:$0xff]  ;;  %s873_s23 = smov 1   ;;  %v75_v4 = vlaneseq }
   0xd   :  { %v70_v2 = vld [vmem:[#allocation2 + $0x8] sm:$0xff]  ;;  %v744_v3 = vpack.i.bf16 %v943_v1, %v938_v0  ;;  %143 = vmatpush.msra.mxu2 %v938_v0  ;;  %163 = vmatpush.msra.mxu3 %v943_v1  ;;  %s874_s24 = smov 126   ;;  %s875_s0 = smov 127   ;;  %v80_v12 = vld [vmem:[#allocation2] sm:$0xff]  ;;  %v230_v17 = vld [vmem:[#allocation2 + $0x18] sm:$0xff]  ;;  %v877_v34 = vmov 0  }
   0xe   :  { %716 = vmatmul.msk.f32.vlgmr.msra.gmra.mxu2 %vm81_vm0, %v70_v2  ;;  %717 = vmatmul.msk.f32.vlgmr.msra.gmra.mxu3 %vm81_vm0, %v70_v2  ;;  %s876_s25 = smov 125   ;;  %v955_v5 = vand.u32 127, %v75_v4  ;;  %v176_v24 = vld [vmem:[#allocation2 + $0x10] sm:$0xff]  ;;  %v284_v29 = vld [vmem:[#allocation2 + $0x20] sm:$0xff]  ;;  %s703_s15 = sshll.u32 %s1047_s9, 4  ;;  %s704_s15 = int_to_ptr.hbm [resolvable:$true] %s703_s15 }
   0xf   :  { %745 = vrot.lane.b32.xlu0 %v744_v3, %s873_s23  ;;  %755 = vrot.lane.b32.xlu1 %v744_v3, %s874_s24  ;;  %v365_v30 = vld [vmem:[%s1043_s5] sm:$0xff] }
  0x10   :  { %vm77_vm1 = vcmp.lt.s32.totalorder %v955_v5, 1  ;;  %vm226_vm2 = vcmp.lt.s32.totalorder %v955_v5, 126  ;;  %vm172_vm3 = vcmp.lt.s32.totalorder %v955_v5, 127  ;;  %vm280_vm4 = vcmp.lt.s32.totalorder %v955_v5, 125  ;;  %v373_v31 = vld [vmem:[%s1044_s6] sm:$0xff]  ;;  %764 = vset.pattern.permute.xlu0 %v877_v34  ;;  %765 = vset.pattern.permute.xlu1 %v877_v34 }
  0x11   :  { %786 = vset.pattern.permute.xlu2 %v877_v34  ;;  %v67_v45 = vld [vmem:[%s1039_s1] sm:$0x3] }
  0x12   :  { %v331_v48 = vperm.slane %v67_v45, 0  ;;  %v332_v49 = vperm.slane %v67_v45, 1  ;;  %v682_v5 = vld [vmem:[%s1046_s8] sm:$0xff] }
  0x17   :  { %750 = vrot.lane.b32.xlu0 %v744_v3, %s875_s0  ;;  %760 = vrot.lane.b32.xlu1 %v744_v3, %s876_s25 }
  0x1f   :  { %368 = vperm.xlu0 %764, %v365_v30   ;;  %376 = vperm.xlu1 %765, %v373_v31  }
  0x81   :  { %v746_v6 = vpop.permute.xlu0 %745  ;;  %v756_v7 = vpop.permute.xlu1 %755 }
  0x82   :  { %v748_v8 = vunpack.i.h.bf16 %v746_v6  ;;  %v747_v9 = vunpack.i.l.bf16 %v746_v6  ;;  %v758_v10 = vunpack.i.h.bf16 %v756_v7  ;;  %v757_v11 = vunpack.i.l.bf16 %v756_v7 }
  0x84   :  { %v79_v13 = vsel %vm77_vm1, %v748_v8, %v747_v9  ;;  %v78_v14 = vsel %vm77_vm1, %v747_v9, %v748_v8  ;;  %v228_v15 = vsel %vm226_vm2, %v758_v10, %v757_v11  ;;  %v227_v16 = vsel %vm226_vm2, %v757_v11, %v758_v10 }
  0x85   :  { %100 = vmatpush.msra.mxu0 %v79_v13  ;;  %120 = vmatpush.msra.mxu1 %v78_v14 }
  0x86   :  { %714 = vmatmul.msk.f32.vlgmr.msra.gmra.mxu0 %vm81_vm0, %v80_v12  ;;  %715 = vmatmul.msk.f32.vlgmr.msra.gmra.mxu1 %vm81_vm0, %v80_v12 }
  0x87   :  { %269 = vmatpush.msrb.mxu3 %v228_v15  ;;  %249 = vmatpush.msrb.mxu2 %v227_v16 }
  0x88   :  { %720 = vmatmul.msk.f32.vlgmr.msrb.gmra.mxu2 %vm81_vm0, %v230_v17  ;;  %721 = vmatmul.msk.f32.vlgmr.msrb.gmra.mxu3 %vm81_vm0, %v230_v17 }
  0x89   :  { %v751_v18 = vpop.permute.xlu0 %750  ;;  %v761_v19 = vpop.permute.xlu1 %760 }
  0x8a   :  { %v753_v20 = vunpack.i.h.bf16 %v751_v18  ;;  %v752_v21 = vunpack.i.l.bf16 %v751_v18  ;;  %v763_v22 = vunpack.i.h.bf16 %v761_v19  ;;  %v762_v23 = vunpack.i.l.bf16 %v761_v19 }
  0x8c   :  { %v173_v25 = vsel %vm172_vm3, %v752_v21, %v753_v20  ;;  %v174_v26 = vsel %vm172_vm3, %v753_v20, %v752_v21  ;;  %v281_v27 = vsel %vm280_vm4, %v762_v23, %v763_v22  ;;  %v282_v28 = vsel %vm280_vm4, %v763_v22, %v762_v23 }
  0x8d   :  { %195 = vmatpush.msrb.mxu0 %v173_v25  ;;  %215 = vmatpush.msrb.mxu1 %v174_v26 }
  0x8e   :  { %718 = vmatmul.msk.f32.vlgmr.msrb.gmra.mxu0 %vm81_vm0, %v176_v24  ;;  %719 = vmatmul.msk.f32.vlgmr.msrb.gmra.mxu1 %vm81_vm0, %v176_v24 }
  0x8f   :  { %303 = vmatpush.msra.mxu0 %v281_v27  ;;  %323 = vmatpush.msra.mxu1 %v282_v28 }
  0x91   :  { %v145_v35 = vpop.f32.mrf.mxu2  ;;  %v165_v36 = vpop.f32.mrf.mxu3 }
  0x92   :  { %v369_v15 = vpop.permute.xlu0 %368  ;;  %v377_v19 = vpop.permute.xlu1 %376 }
  0x96   :  { %722 = vmatmul.msk.f32.vlgmr.msra.gmra.mxu0 %vm81_vm0, %v284_v29  ;;  %723 = vmatmul.msk.f32.vlgmr.msra.gmra.mxu1 %vm81_vm0, %v284_v29  ;;  %v386_v29 = vld [vmem:[#allocation5 + $0x8] sm:$0xff] }
 0x103   :  { %v102_v32 = vpop.f32.mrf.mxu0  ;;  %v122_v33 = vpop.f32.mrf.mxu1 }
 0x104   :  { %v146_v39 = vadd.f32 %v145_v35, %v102_v32  ;;  %v166_v40 = vadd.f32 %v165_v36, %v122_v33  ;;  %v393_v33 = vld [vmem:[#allocation5] sm:$0xff] }
 0x10b   :  { %v197_v37 = vpop.f32.mrf.mxu0  ;;  %v217_v38 = vpop.f32.mrf.mxu1 }
 0x10c   :  { %v220_v41 = vadd.f32 %v197_v37, %v146_v39  ;;  %v221_v42 = vadd.f32 %v217_v38, %v166_v40  ;;  %v251_v43 = vpop.f32.mrf.mxu2  ;;  %v271_v44 = vpop.f32.mrf.mxu3 }
 0x10e   :  { %v274_v46 = vadd.f32 %v251_v43, %v220_v41  ;;  %v275_v47 = vadd.f32 %v271_v44, %v221_v42  ;;  %v487_v42 = vld [vmem:[#allocation5 + $0x10] sm:$0xff] }
 0x113   :  { %v305_v50 = vpop.f32.mrf.mxu0  ;;  %v325_v51 = vpop.f32.mrf.mxu1 }
 0x114   :  { %v328_v52 = vadd.f32 %v305_v50, %v274_v46  ;;  %v329_v53 = vadd.f32 %v325_v51, %v275_v47  ;;  %v593_v50 = vld [vmem:[#allocation5 + $0x20] sm:$0xff] }
 0x116   :  { %v335_v54 = vmul.f32 %v331_v48, %v328_v52  ;;  %v336_v55 = vmul.f32 %v332_v49, %v329_v53 }
 0x118   :  { %v337_v56 = vadd.f32 %v336_v55, %v335_v54  ;;  %v341_v57 = vmul.f32 %v335_v54, %v335_v54  ;;  %v342_v58 = vmul.f32 %v336_v55, %v336_v55  ;;  %v674_v54 = vld [vmem:[%s1045_s7] sm:$0xff] }
 0x11a   :  { %338 = vadd.xlane.f32.xlu2 %v337_v56  ;;  %v343_v59 = vadd.f32 %v342_v58, %v341_v57 }
 0x122   :  { %344 = vadd.xlane.f32.xlu2 %v343_v59 }
 0x18d   :  { %v339_v60 = vpop.xlane.xlu2 %338 }
 0x18e   :  { %v340_v61 = vmul.f32 0.016666668, %v339_v60 }
 0x190   :  { %v347_v63 = vmul.f32 %v340_v61, %v340_v61  ;;  %v350_v13 = vsub.f32 %v328_v52, %v340_v61  ;;  %v351_v14 = vsub.f32 %v329_v53, %v340_v61  ;;  %v540_v53 = vld [vmem:[#allocation5 + $0x18] sm:$0xff] }
 0x195   :  { %v345_v62 = vpop.xlane.xlu2 %344 }
 0x196   :  { %v346_v2 = vmul.f32 0.016666668, %v345_v62 }
 0x198   :  { %v348_v3 = vsub.f32 %v346_v2, %v347_v63 }
 0x19a   :  { %v349_v4 = vmax.f32 %v348_v3, 0.0 }
 0x19c   :  { %v352_v6 = vadd.f32 1e-05, %v349_v4 }
 0x19e   :  { %787 = vrsqrt.f32 %v352_v6  ;;  %vm359_vm6 = vweird.f32 %v352_v6 }
 0x1a4   :  { %v788_v7 = vpop.eup %787 }
 0x1a5   :  { %v354_v8 = vmul.f32 %v788_v7, %v352_v6  ;;  %vm360_vm5 = vweird.f32 %v788_v7  ;;  %v68_v6 = vld [vmem:[%s1040_s2] sm:$0x3]  ;;  %s878_s2 = smov [#allocation7]  }
 0x1a6   :  { %vm361_vm7 = vmor %vm359_vm6, %vm360_vm5  ;;  %s701_s8 = sshll.u32 %s878_s2, 4  ;;  %s702_s8 = int_to_ptr.vmem [resolvable:$true] %s701_s8 }
 0x1a7   :  { %v355_v9 = vmul.f32 %v788_v7, %v354_v8 }
 0x1a9   :  { %v356_v10 = vmul.f32 0.5, %v355_v9  ;;  %v640_v9 = vperm.slane %v68_v6, 0 }
 0x1ab   :  { %v357_v11 = vsub.f32 1.5, %v356_v10  ;;  %v641_v10 = vperm.slane %v68_v6, 1 }
 0x1ad   :  { %v358_v12 = vmul.f32 %v788_v7, %v357_v11 }
 0x1af   :  { %v362_v16 = vsel %vm361_vm7, %v788_v7, %v358_v12 }
 0x1b0   :  { %v363_v17 = vmul.f32 %v362_v16, %v350_v13  ;;  %v364_v18 = vmul.f32 %v362_v16, %v351_v14 }
 0x1b2   :  { %v371_v20 = vmul.f32 %v369_v15, %v363_v17  ;;  %v372_v21 = vmul.f32 %v369_v15, %v364_v18 }
 0x1b4   :  { %v379_v22 = vadd.f32 %v377_v19, %v371_v20  ;;  %v380_v23 = vadd.f32 %v377_v19, %v372_v21 }
 0x1b6   :  { %v381_v24 = vmax.f32 %v379_v22, 0.0  ;;  %v382_v25 = vmax.f32 %v380_v23, 0.0 }
 0x1b8   :  { %v383_v26 = vmul.f32 %v381_v24, %v331_v48  ;;  %v384_v27 = vmul.f32 %v382_v25, %v332_v49 }
 0x1ba   :  { %455 = vmatpush.msrb.mxu0 %v383_v26  ;;  %475 = vmatpush.msrb.mxu1 %v384_v27  ;;  %v776_v28 = vpack.i.bf16 %v384_v27, %v383_v26 }
 0x1bb   :  { %726 = vmatmul.msk.f32.vlgmr.msrb.gmra.mxu0 %vm81_vm0, %v386_v29  ;;  %727 = vmatmul.msk.f32.vlgmr.msrb.gmra.mxu1 %vm81_vm0, %v386_v29 }
 0x1bc   :  { %777 = vrot.lane.b32.xlu0 %v776_v28, %s876_s25  ;;  %772 = vrot.lane.b32.xlu1 %v776_v28, %s875_s0 }
 0x1bd   :  { %767 = vrot.lane.b32.xlu2 %v776_v28, %s873_s23 }
 0x1c4   :  { %782 = vrot.lane.b32.xlu1 %v776_v28, %s874_s24 }
 0x1c5   :  { %677 = vperm.xlu2 %786, %v674_v54  }
 0x1cd   :  { %685 = vperm.xlu2 %786, %v682_v5  }
 0x217   :  { %v768_v30 = vpop.permute.xlu2 %767 }
 0x218   :  { %v770_v31 = vunpack.i.h.bf16 %v768_v30  ;;  %v769_v32 = vunpack.i.l.bf16 %v768_v30 }
 0x21a   :  { %v392_v34 = vsel %vm77_vm1, %v770_v31, %v769_v32  ;;  %v391_v35 = vsel %vm77_vm1, %v769_v32, %v770_v31 }
 0x21b   :  { %412 = vmatpush.msra.mxu2 %v392_v34  ;;  %432 = vmatpush.msra.mxu3 %v391_v35 }
 0x21c   :  { %724 = vmatmul.msk.f32.vlgmr.msra.gmra.mxu2 %vm81_vm0, %v393_v33  ;;  %725 = vmatmul.msk.f32.vlgmr.msra.gmra.mxu3 %vm81_vm0, %v393_v33 }
 0x21f   :  { %v678_v33 = vpop.permute.xlu2 %677 }
 0x22e   :  { %v778_v36 = vpop.permute.xlu0 %777  ;;  %v773_v37 = vpop.permute.xlu1 %772 }
 0x22f   :  { %v780_v38 = vunpack.i.h.bf16 %v778_v36  ;;  %v779_v39 = vunpack.i.l.bf16 %v778_v36  ;;  %v775_v40 = vunpack.i.h.bf16 %v773_v37  ;;  %v774_v41 = vunpack.i.l.bf16 %v773_v37 }
 0x231   :  { %v484_v43 = vsel %vm172_vm3, %v774_v41, %v775_v40  ;;  %v485_v44 = vsel %vm172_vm3, %v775_v40, %v774_v41  ;;  %v590_v45 = vsel %vm280_vm4, %v779_v39, %v780_v38  ;;  %v591_v46 = vsel %vm280_vm4, %v780_v38, %v779_v39 }
 0x232   :  { %506 = vmatpush.msrb.mxu2 %v484_v43  ;;  %526 = vmatpush.msrb.mxu3 %v485_v44  ;;  %v686_v43 = vpop.permute.xlu2 %685 }
 0x233   :  { %728 = vmatmul.msk.f32.vlgmr.msrb.gmra.mxu2 %vm81_vm0, %v487_v42  ;;  %729 = vmatmul.msk.f32.vlgmr.msrb.gmra.mxu3 %vm81_vm0, %v487_v42 }
 0x234   :  { %612 = vmatpush.msra.mxu2 %v590_v45  ;;  %632 = vmatpush.msra.mxu3 %v591_v46 }
 0x236   :  { %v783_v47 = vpop.permute.xlu1 %782 }
 0x237   :  { %v785_v48 = vunpack.i.h.bf16 %v783_v47  ;;  %v784_v49 = vunpack.i.l.bf16 %v783_v47 }
 0x238   :  { %v457_v57 = vpop.f32.mrf.mxu0  ;;  %v477_v58 = vpop.f32.mrf.mxu1 }
 0x239   :  { %v537_v51 = vsel %vm226_vm2, %v784_v49, %v785_v48  ;;  %v538_v52 = vsel %vm226_vm2, %v785_v48, %v784_v49 }
 0x23a   :  { %559 = vmatpush.msra.mxu0 %v537_v51  ;;  %579 = vmatpush.msra.mxu1 %v538_v52 }
 0x23b   :  { %732 = vmatmul.msk.f32.vlgmr.msra.gmra.mxu2 %vm81_vm0, %v593_v50  ;;  %733 = vmatmul.msk.f32.vlgmr.msra.gmra.mxu3 %vm81_vm0, %v593_v50 }
 0x23c   :  { %730 = vmatmul.msk.f32.vlgmr.msra.gmra.mxu0 %vm81_vm0, %v540_v53  ;;  %731 = vmatmul.msk.f32.vlgmr.msra.gmra.mxu1 %vm81_vm0, %v540_v53 }
 0x29f   :  { %v414_v55 = vpop.f32.mrf.mxu2  ;;  %v434_v56 = vpop.f32.mrf.mxu3 }
 0x2a0   :  { %v458_v61 = vadd.f32 %v457_v57, %v414_v55  ;;  %v478_v62 = vadd.f32 %v477_v58, %v434_v56 }
 0x2b6   :  { %v508_v59 = vpop.f32.mrf.mxu2  ;;  %v528_v60 = vpop.f32.mrf.mxu3 }
 0x2b7   :  { %v531_v63 = vadd.f32 %v508_v59, %v458_v61  ;;  %v532_v2 = vadd.f32 %v528_v60, %v478_v62 }
 0x2b9   :  { %v561_v3 = vpop.f32.mrf.mxu0  ;;  %v581_v4 = vpop.f32.mrf.mxu1 }
 0x2ba   :  { %v584_v7 = vadd.f32 %v561_v3, %v531_v63  ;;  %v585_v8 = vadd.f32 %v581_v4, %v532_v2 }
 0x2be   :  { %v614_v11 = vpop.f32.mrf.mxu2  ;;  %v634_v12 = vpop.f32.mrf.mxu3 }
 0x2bf   :  { %v637_v13 = vadd.f32 %v614_v11, %v584_v7  ;;  %v638_v14 = vadd.f32 %v634_v12, %v585_v8 }
 0x2c1   :  { %v644_v15 = vmul.f32 %v640_v9, %v637_v13  ;;  %v645_v16 = vmul.f32 %v641_v10, %v638_v14 }
 0x2c3   :  { %v646_v17 = vadd.f32 %v645_v16, %v644_v15  ;;  %v650_v18 = vmul.f32 %v644_v15, %v644_v15  ;;  %v651_v19 = vmul.f32 %v645_v16, %v645_v16 }
 0x2c5   :  { %647 = vadd.xlane.f32.xlu0 %v646_v17  ;;  %v652_v20 = vadd.f32 %v651_v19, %v650_v18 }
 0x2c7   :  { %653 = vadd.xlane.f32.xlu1 %v652_v20 }
 0x338   :  { %v648_v21 = vpop.xlane.xlu0 %647 }
 0x339   :  { %v649_v22 = vmul.f32 0.017857144, %v648_v21 }
 0x33a   :  { %v654_v23 = vpop.xlane.xlu1 %653 }
 0x33b   :  { %v655_v24 = vmul.f32 0.017857144, %v654_v23  ;;  %v656_v25 = vmul.f32 %v649_v22, %v649_v22  ;;  %v659_v36 = vsub.f32 %v637_v13, %v649_v22  ;;  %v660_v37 = vsub.f32 %v638_v14, %v649_v22 }
 0x33d   :  { %v657_v26 = vsub.f32 %v655_v24, %v656_v25 }
 0x33f   :  { %v658_v27 = vmax.f32 %v657_v26, 0.0 }
 0x341   :  { %v661_v28 = vadd.f32 1e-05, %v658_v27 }
 0x343   :  { %789 = vrsqrt.f32 %v661_v28  ;;  %vm668_vm9 = vweird.f32 %v661_v28 }
 0x349   :  { %v790_v29 = vpop.eup %789 }
 0x34a   :  { %v663_v30 = vmul.f32 %v790_v29, %v661_v28  ;;  %vm669_vm8 = vweird.f32 %v790_v29 }
 0x34b   :  { %vm670_vm10 = vmor %vm668_vm9, %vm669_vm8 }
 0x34c   :  { %v664_v31 = vmul.f32 %v790_v29, %v663_v30 }
 0x34e   :  { %v665_v32 = vmul.f32 0.5, %v664_v31 }
 0x350   :  { %v666_v34 = vsub.f32 1.5, %v665_v32 }
 0x352   :  { %v667_v35 = vmul.f32 %v790_v29, %v666_v34 }
 0x354   :  { %v671_v38 = vsel %vm670_vm10, %v790_v29, %v667_v35 }
 0x355   :  { %v672_v39 = vmul.f32 %v671_v38, %v659_v36  ;;  %v673_v40 = vmul.f32 %v671_v38, %v660_v37 }
 0x357   :  { %v680_v41 = vmul.f32 %v678_v33, %v672_v39  ;;  %v681_v42 = vmul.f32 %v678_v33, %v673_v40 }
 0x359   :  { %v688_v44 = vadd.f32 %v686_v43, %v680_v41  ;;  %v689_v45 = vadd.f32 %v686_v43, %v681_v42 }
 0x35b   :  { %v690_v46 = vadd.f32 %v688_v44, %v938_v0  ;;  %v691_v47 = vadd.f32 %v689_v45, %v943_v1 }
 0x35d   :  { %v692_v48 = vmax.f32 %v690_v46, 0.0  ;;  %v693_v49 = vmax.f32 %v691_v47, 0.0 }
 0x35f   :  { %694 = vst [vmem:[#allocation7] sm:$0xff] %v692_v48 }
 0x360   :  { %695 = vst [vmem:[#allocation7 + $0x8] sm:$0xff] %v693_v49 }
 0x361   :  { %706 = dma.vmem_to_hbm [thread:$0]  %s702_s8, 256, %s704_s15, [#allocation4]  }
 0x362   :  { %867 = dma.done.wait [#allocation4], 256  }
 0x363   :  { %868 = vsyncadd [#allocation4], 4294967040 }
 0x364   :  { %711 = vsyncpa [#allocation3], 1 }
 0x365   :  { %712 = vsyncpa [#allocation6], 1 }
 0x366   :  { %713 = vsyncpa [#allocation4], 1 }

</bundles_post_ra>
